<compile_context>
chip_gen: v7x
topology: tpu7x:2x2x1
jax: 0.10.0
libtpu: 0.0.40
codegen_flags: <defaults>
</compile_context>

<pallas_src>
import math

import jax
import jax.numpy as jnp
from jax.experimental import pallas as pl
from jax.experimental.pallas import tpu as pltpu

_LANE = 128
_SUBLANE = 8


def _round_up(x, m):
    return ((x + m - 1) // m) * m


def _pad_to(a, shape):
    pads = [(0, t - s) for s, t in zip(a.shape, shape)]
    if all(p == (0, 0) for p in pads):
        return a
    return jnp.pad(a, pads)


def _mlp_kernel(x_ref, w1_ref, b1_ref, w2_ref, b2_ref, o_ref):
    # fc1 on the MXU.  Inputs are cast to the weights' dtype (no-op for f32,
    # bf16 MXU feed when bf16 weights are used); accumulation is always f32.
    x = x_ref[...].astype(w1_ref.dtype)
    h = jnp.dot(x, w1_ref[...], preferred_element_type=jnp.float32)
    h = h + b1_ref[...]  # f32 bias add (VPU)

    # exact (erf-based) GELU in f32, matching torch.nn.GELU() default
    inv_sqrt2 = jnp.float32(1.0 / math.sqrt(2.0))
    h = 0.5 * h * (1.0 + jax.lax.erf(h * inv_sqrt2))

    # fc2
    out = jnp.dot(h.astype(w2_ref.dtype), w2_ref[...],
                  preferred_element_type=jnp.float32)
    out = out + b2_ref[...]
    o_ref[...] = out.astype(o_ref.dtype)


def regression_model_forward(x, w1, b1, w2, b2, *, block_b=128, mxu_dtype=None):
    """Fused Linear -> GELU -> Linear (forward of RegressionModel).

    x:  (B, p_in)
    w1: (p_in, hidden), b1: (hidden,)
    w2: (hidden, p_out), b2: (p_out,)
    block_b:   target batch tile (rounded up to a multiple of 128); small
               batches run as one grid step.
    mxu_dtype: optional dtype (e.g. jnp.bfloat16) for the MXU inputs on
               v6e/v7x; accumulation, bias and GELU stay f32.
    Returns (B, p_out) in x.dtype.
    """
    B, p_in = x.shape
    hidden = w1.shape[1]
    p_out = w2.shape[1]

    # Only the weight/hidden axis is padded (tiny, DMA'd once, VMEM-resident);
    # p_in / p_out stay at their true sizes -> no extra x/out HBM traffic.
    hid_p = _round_up(hidden, _LANE)

    # Batch tiling: one big step for small B, 128-aligned tiles otherwise
    # (use block_b=256 on v6e/v7x for a bit more amortization if desired).
    block_b = max(_LANE, _round_up(block_b, _LANE))
    b8 = _round_up(B, _SUBLANE)
    tm = b8 if b8 <= block_b else block_b
    b_p = _round_up(B, tm)

    x_p = _pad_to(x, (b_p, p_in))
    w1_p = _pad_to(w1, (p_in, hid_p))
    b1_p = _pad_to(b1.reshape(1, hidden), (1, hid_p)).astype(jnp.float32)
    w2_p = _pad_to(w2, (hid_p, p_out))
    b2_p = b2.reshape(1, p_out).astype(jnp.float32)
    if mxu_dtype is not None:
        w1_p = w1_p.astype(mxu_dtype)
        w2_p = w2_p.astype(mxu_dtype)

    grid = (b_p // tm,)

    itemsize = x.dtype.itemsize
    weight_bytes = (w1_p.size * w1_p.dtype.itemsize
                    + w2_p.size * w2_p.dtype.itemsize
                    + (b1_p.size + b2_p.size) * 4)
    cost = pl.CostEstimate(
        flops=2 * b_p * (p_in * hid_p + hid_p * p_out),
        transcendentals=b_p * hid_p,
        bytes_accessed=b_p * p_in * itemsize + weight_bytes + b_p * p_out * itemsize,
    )

    def _run(single_buffer_weights):
        w_kwargs = (dict(pipeline_mode=pl.Buffered(1))
                    if single_buffer_weights else {})
        in_specs = [
            # x tile: pipelined / double-buffered over the batch grid.
            pl.BlockSpec((tm, p_in), lambda i: (i, 0)),
            # weights & biases: constant block -> DMA'd once, VMEM-resident.
            pl.BlockSpec((p_in, hid_p), lambda i: (0, 0), **w_kwargs),
            pl.BlockSpec((1, hid_p), lambda i: (0, 0), **w_kwargs),
            pl.BlockSpec((hid_p, p_out), lambda i: (0, 0), **w_kwargs),
            pl.BlockSpec((1, p_out), lambda i: (0, 0), **w_kwargs),
        ]
        return pl.pallas_call(
            _mlp_kernel,
            out_shape=jax.ShapeDtypeStruct((b_p, p_out), x.dtype),
            grid=grid,
            in_specs=in_specs,
            out_specs=pl.BlockSpec((tm, p_out), lambda i: (i, 0)),
            compiler_params=pltpu.CompilerParams(
                dimension_semantics=("parallel",),
            ),
            cost_estimate=cost,
        )(x_p, w1_p, b1_p, w2_p, b2_p)

    try:
        out_p = _run(True)
    except Exception:
        # pipeline_mode/Buffered(1) unsupported on this JAX version -> default
        # (double-buffered) weight specs; functionally identical.
        out_p = _run(False)

    return out_p[:B] if b_p != B else out_p


def init_params(key, p_in, p_out, dtype=jnp.float32):
    """Deterministic init mirroring torch.nn.Linear's default:
    U(-1/sqrt(fan_in), 1/sqrt(fan_in)) for both weight and bias."""
    hidden = 10 * (p_in + p_out) // 2
    k1, k2, k3, k4 = jax.random.split(key, 4)
    bound1 = 1.0 / math.sqrt(p_in)
    bound2 = 1.0 / math.sqrt(hidden)
    w1 = jax.random.uniform(k1, (p_in, hidden), dtype, -bound1, bound1)
    b1 = jax.random.uniform(k2, (hidden,), dtype, -bound1, bound1)
    w2 = jax.random.uniform(k3, (hidden, p_out), dtype, -bound2, bound2)
    b2 = jax.random.uniform(k4, (p_out,), dtype, -bound2, bound2)
    return w1, b1, w2, b2


def _reference(x, w1, b1, w2, b2):
    h = x @ w1 + b1
    h = 0.5 * h * (1.0 + jax.lax.erf(h / jnp.sqrt(2.0)))
    return h @ w2 + b2


if __name__ == "__main__":
    # Shapes consistent with the module:
    #   T_in = 4, total_vector_a_elements_i = 2         -> parameters_in  = 8
    #   T_out_sub... = 4, total_vector_u_elements_i = 2 -> parameters_out = 8
    #   hidden = 10 * (8 + 8) // 2 = 80
    T_in, a_elems = 4, 2
    T_out_f, u_elems = 4, 2
    p_in = T_in * a_elems
    p_out = T_out_f * u_elems

    key = jax.random.PRNGKey(0)
    kx1, kx2, kp = jax.random.split(key, 3)
    w1, b1, w2, b2 = init_params(kp, p_in, p_out)

    # 1) small batch -> single grid step (whole batch in one tile), f32.
    x_small = jax.random.normal(kx1, (16, p_in), dtype=jnp.float32)
    out_small = jax.block_until_ready(
        regression_model_forward(x_small, w1, b1, w2, b2))
    ref_small = _reference(x_small, w1, b1, w2, b2)
    assert out_small.shape == (16, p_out)
    assert jnp.allclose(out_small, ref_small, atol=1e-5, rtol=1e-5), \
        "f32 single-tile mismatch vs reference"

    # 2) larger batch (not a multiple of 128) -> multi-step parallel batch
    #    grid with batch padding + trailing batch slice, f32.
    x_big = jax.random.normal(kx2, (300, p_in), dtype=jnp.float32)
    out_big = jax.block_until_ready(
        regression_model_forward(x_big, w1, b1, w2, b2, block_b=128))
    ref_big = _reference(x_big, w1, b1, w2, b2)
    assert out_big.shape == (300, p_out)
    assert jnp.allclose(out_big, ref_big, atol=1e-5, rtol=1e-5), \
        "f32 multi-tile mismatch vs reference"

    # 3) bf16 MXU-input variant (v6e/v7x lever): looser tolerance vs f32 ref.
    out_bf16 = jax.block_until_ready(
        regression_model_forward(x_small, w1, b1, w2, b2,
                                 mxu_dtype=jnp.bfloat16))
    assert jnp.allclose(out_bf16, ref_small, atol=5e-2, rtol=5e-2), \
        "bf16-MXU variant mismatch vs reference"

    print("KERNEL_OK")
</pallas_src>

<mosaic_0001>
module attributes {stable_mosaic.version = 11 : i64} {
  func.func @_mlp_kernel(%arg0: i32, %arg1: memref<16x8xf32, #tpu.memory_space<vmem>>, %arg2: memref<8x128xf32, #tpu.memory_space<vmem>>, %arg3: memref<1x128xf32, #tpu.memory_space<vmem>>, %arg4: memref<128x8xf32, #tpu.memory_space<vmem>>, %arg5: memref<1x8xf32, #tpu.memory_space<vmem>>, %arg6: memref<16x8xf32, #tpu.memory_space<vmem>>) attributes {dimension_semantics = [#tpu.dimension_semantics<parallel>], iteration_bounds = array<i64: 1>, scalar_prefetch = 0 : i64, scratch_operands = 0 : i64, tpu.core_type = #tpu.core_type<tc>, window_params = [{transform_indices = @transform_0, window_bounds = array<i64: 16, 8>}, {pipeline_mode = #tpu.pipeline_mode<synchronous>, transform_indices = @transform_1, window_bounds = array<i64: 8, 128>}, {pipeline_mode = #tpu.pipeline_mode<synchronous>, transform_indices = @transform_2, window_bounds = array<i64: 1, 128>}, {pipeline_mode = #tpu.pipeline_mode<synchronous>, transform_indices = @transform_3, window_bounds = array<i64: 128, 8>}, {pipeline_mode = #tpu.pipeline_mode<synchronous>, transform_indices = @transform_4, window_bounds = array<i64: 1, 8>}, {transform_indices = @transform_5, window_bounds = array<i64: 16, 8>}]} {
    %c0 = arith.constant 0 : index
    %c0_0 = arith.constant 0 : index
    %0 = vector.load %arg1[%c0, %c0_0] : memref<16x8xf32, #tpu.memory_space<vmem>>, vector<16x8xf32>
    %c0_1 = arith.constant 0 : index
    %c0_2 = arith.constant 0 : index
    %1 = vector.load %arg2[%c0_1, %c0_2] : memref<8x128xf32, #tpu.memory_space<vmem>>, vector<8x128xf32>
    %cst = arith.constant dense<0.000000e+00> : vector<16x128xf32>
    %2 = tpu.matmul %0, %1, %cst {dimension_numbers = #tpu.dot_dimension_numbers<[1], [0], [0], [1], [0, 0, 1, 1], [], []>} : vector<16x8xf32>, vector<8x128xf32>, vector<16x128xf32> -> vector<16x128xf32>
    %c0_3 = arith.constant 0 : index
    %c0_4 = arith.constant 0 : index
    %3 = vector.load %arg3[%c0_3, %c0_4] : memref<1x128xf32, #tpu.memory_space<vmem>>, vector<1x128xf32>
    %4 = vector.broadcast %3 : vector<1x128xf32> to vector<16x128xf32>
    %5 = arith.addf %2, %4 : vector<16x128xf32>
    %cst_5 = arith.constant 5.000000e-01 : f32
    %6 = vector.broadcast %cst_5 : f32 to vector<16x128xf32>
    %7 = arith.mulf %6, %5 : vector<16x128xf32>
    %cst_6 = arith.constant 0.707106769 : f32
    %8 = vector.broadcast %cst_6 : f32 to vector<16x128xf32>
    %9 = arith.mulf %5, %8 : vector<16x128xf32>
    %10 = math.erf %9 : vector<16x128xf32>
    %cst_7 = arith.constant 1.000000e+00 : f32
    %11 = vector.broadcast %cst_7 : f32 to vector<16x128xf32>
    %12 = arith.addf %11, %10 : vector<16x128xf32>
    %13 = arith.mulf %7, %12 : vector<16x128xf32>
    %c0_8 = arith.constant 0 : index
    %c0_9 = arith.constant 0 : index
    %14 = vector.load %arg4[%c0_8, %c0_9] : memref<128x8xf32, #tpu.memory_space<vmem>>, vector<128x8xf32>
    %cst_10 = arith.constant dense<0.000000e+00> : vector<16x8xf32>
    %15 = tpu.matmul %13, %14, %cst_10 {dimension_numbers = #tpu.dot_dimension_numbers<[1], [0], [0], [1], [0, 0, 1, 1], [], []>} : vector<16x128xf32>, vector<128x8xf32>, vector<16x8xf32> -> vector<16x8xf32>
    %c0_11 = arith.constant 0 : index
    %c0_12 = arith.constant 0 : index
    %16 = vector.load %arg5[%c0_11, %c0_12] : memref<1x8xf32, #tpu.memory_space<vmem>>, vector<1x8xf32>
    %17 = vector.broadcast %16 : vector<1x8xf32> to vector<16x8xf32>
    %18 = arith.addf %15, %17 : vector<16x8xf32>
    %c0_13 = arith.constant 0 : index
    %c0_14 = arith.constant 0 : index
    %19 = vector.load %arg6[%c0_13, %c0_14] : memref<16x8xf32, #tpu.memory_space<vmem>>, vector<16x8xf32>
    tpu.vector_store %arg6[%c0_13, %c0_14], %18 {strides = array<i32>} : memref<16x8xf32, #tpu.memory_space<vmem>>, vector<16x8xf32>,
    return
  }
  func.func @transform_0(%arg0: i32) -> (i32, i32) {
    %c0_i32 = arith.constant 0 : i32
    %c0_i32_0 = arith.constant 0 : i32
    return %arg0, %c0_i32 : i32, i32
  }
  func.func @transform_1(%arg0: i32) -> (i32, i32) {
    %c0_i32 = arith.constant 0 : i32
    %c0_i32_0 = arith.constant 0 : i32
    %c0_i32_1 = arith.constant 0 : i32
    return %c0_i32, %c0_i32_0 : i32, i32
  }
  func.func @transform_2(%arg0: i32) -> (i32, i32) {
    %c0_i32 = arith.constant 0 : i32
    %c0_i32_0 = arith.constant 0 : i32
    %c0_i32_1 = arith.constant 0 : i32
    return %c0_i32, %c0_i32_0 : i32, i32
  }
  func.func @transform_3(%arg0: i32) -> (i32, i32) {
    %c0_i32 = arith.constant 0 : i32
    %c0_i32_0 = arith.constant 0 : i32
    %c0_i32_1 = arith.constant 0 : i32
    return %c0_i32, %c0_i32_0 : i32, i32
  }
  func.func @transform_4(%arg0: i32) -> (i32, i32) {
    %c0_i32 = arith.constant 0 : i32
    %c0_i32_0 = arith.constant 0 : i32
    %c0_i32_1 = arith.constant 0 : i32
    return %c0_i32, %c0_i32_0 : i32, i32
  }
  func.func @transform_5(%arg0: i32) -> (i32, i32) {
    %c0_i32 = arith.constant 0 : i32
    %c0_i32_0 = arith.constant 0 : i32
    return %arg0, %c0_i32 : i32, i32
  }
}

module attributes {stable_mosaic.version = 11 : i64} {
  func.func @_mlp_kernel(%arg0: i32, %arg1: memref<16x8xf32, #tpu.memory_space<vmem>>, %arg2: memref<8x128xf32, #tpu.memory_space<vmem>>, %arg3: memref<1x128xf32, #tpu.memory_space<vmem>>, %arg4: memref<128x8xf32, #tpu.memory_space<vmem>>, %arg5: memref<1x8xf32, #tpu.memory_space<vmem>>, %arg6: memref<16x8xf32, #tpu.memory_space<vmem>>) attributes {dimension_semantics = [#tpu.dimension_semantics<parallel>], iteration_bounds = array<i64: 1>, scalar_prefetch = 0 : i64, scratch_operands = 0 : i64, tpu.core_type = #tpu.core_type<tc>, window_params = [{transform_indices = @transform_0, window_bounds = array<i64: 16, 8>}, {pipeline_mode = #tpu.pipeline_mode<synchronous>, transform_indices = @transform_1, window_bounds = array<i64: 8, 128>}, {pipeline_mode = #tpu.pipeline_mode<synchronous>, transform_indices = @transform_2, window_bounds = array<i64: 1, 128>}, {pipeline_mode = #tpu.pipeline_mode<synchronous>, transform_indices = @transform_3, window_bounds = array<i64: 128, 8>}, {pipeline_mode = #tpu.pipeline_mode<synchronous>, transform_indices = @transform_4, window_bounds = array<i64: 1, 8>}, {transform_indices = @transform_5, window_bounds = array<i64: 16, 8>}]} {
    %c0 = arith.constant 0 : index
    %c0_0 = arith.constant 0 : index
    %0 = vector.load %arg1[%c0, %c0_0] : memref<16x8xf32, #tpu.memory_space<vmem>>, vector<16x8xf32>
    %c0_1 = arith.constant 0 : index
    %c0_2 = arith.constant 0 : index
    %1 = vector.load %arg2[%c0_1, %c0_2] : memref<8x128xf32, #tpu.memory_space<vmem>>, vector<8x128xf32>
    %cst = arith.constant dense<0.000000e+00> : vector<16x128xf32>
    %2 = tpu.matmul %0, %1, %cst {dimension_numbers = #tpu.dot_dimension_numbers<[1], [0], [0], [1], [0, 0, 1, 1], [], []>} : vector<16x8xf32>, vector<8x128xf32>, vector<16x128xf32> -> vector<16x128xf32>
    %c0_3 = arith.constant 0 : index
    %c0_4 = arith.constant 0 : index
    %3 = vector.load %arg3[%c0_3, %c0_4] : memref<1x128xf32, #tpu.memory_space<vmem>>, vector<1x128xf32>
    %4 = vector.broadcast %3 : vector<1x128xf32> to vector<16x128xf32>
    %5 = arith.addf %2, %4 : vector<16x128xf32>
    %cst_5 = arith.constant 5.000000e-01 : f32
    %6 = vector.broadcast %cst_5 : f32 to vector<16x128xf32>
    %7 = arith.mulf %6, %5 : vector<16x128xf32>
    %cst_6 = arith.constant 0.707106769 : f32
    %8 = vector.broadcast %cst_6 : f32 to vector<16x128xf32>
    %9 = arith.mulf %5, %8 : vector<16x128xf32>
    %10 = math.erf %9 : vector<16x128xf32>
    %cst_7 = arith.constant 1.000000e+00 : f32
    %11 = vector.broadcast %cst_7 : f32 to vector<16x128xf32>
    %12 = arith.addf %11, %10 : vector<16x128xf32>
    %13 = arith.mulf %7, %12 : vector<16x128xf32>
    %c0_8 = arith.constant 0 : index
    %c0_9 = arith.constant 0 : index
    %14 = vector.load %arg4[%c0_8, %c0_9] : memref<128x8xf32, #tpu.memory_space<vmem>>, vector<128x8xf32>
    %cst_10 = arith.constant dense<0.000000e+00> : vector<16x8xf32>
    %15 = tpu.matmul %13, %14, %cst_10 {dimension_numbers = #tpu.dot_dimension_numbers<[1], [0], [0], [1], [0, 0, 1, 1], [], []>} : vector<16x128xf32>, vector<128x8xf32>, vector<16x8xf32> -> vector<16x8xf32>
    %c0_11 = arith.constant 0 : index
    %c0_12 = arith.constant 0 : index
    %16 = vector.load %arg5[%c0_11, %c0_12] : memref<1x8xf32, #tpu.memory_space<vmem>>, vector<1x8xf32>
    %17 = vector.broadcast %16 : vector<1x8xf32> to vector<16x8xf32>
    %18 = arith.addf %15, %17 : vector<16x8xf32>
    %c0_13 = arith.constant 0 : index
    %c0_14 = arith.constant 0 : index
    %19 = vector.load %arg6[%c0_13, %c0_14] : memref<16x8xf32, #tpu.memory_space<vmem>>, vector<16x8xf32>
    tpu.vector_store %arg6[%c0_13, %c0_14], %18 {strides = array<i32>} : memref<16x8xf32, #tpu.memory_space<vmem>>, vector<16x8xf32>,
    return
  }
  func.func @transform_0(%arg0: i32) -> (i32, i32) {
    %c0_i32 = arith.constant 0 : i32
    %c0_i32_0 = arith.constant 0 : i32
    return %arg0, %c0_i32 : i32, i32
  }
  func.func @transform_1(%arg0: i32) -> (i32, i32) {
    %c0_i32 = arith.constant 0 : i32
    %c0_i32_0 = arith.constant 0 : i32
    %c0_i32_1 = arith.constant 0 : i32
    return %c0_i32, %c0_i32_0 : i32, i32
  }
  func.func @transform_2(%arg0: i32) -> (i32, i32) {
    %c0_i32 = arith.constant 0 : i32
    %c0_i32_0 = arith.constant 0 : i32
    %c0_i32_1 = arith.constant 0 : i32
    return %c0_i32, %c0_i32_0 : i32, i32
  }
  func.func @transform_3(%arg0: i32) -> (i32, i32) {
    %c0_i32 = arith.constant 0 : i32
    %c0_i32_0 = arith.constant 0 : i32
    %c0_i32_1 = arith.constant 0 : i32
    return %c0_i32, %c0_i32_0 : i32, i32
  }
  func.func @transform_4(%arg0: i32) -> (i32, i32) {
    %c0_i32 = arith.constant 0 : i32
    %c0_i32_0 = arith.constant 0 : i32
    %c0_i32_1 = arith.constant 0 : i32
    return %c0_i32, %c0_i32_0 : i32, i32
  }
  func.func @transform_5(%arg0: i32) -> (i32, i32) {
    %c0_i32 = arith.constant 0 : i32
    %c0_i32_0 = arith.constant 0 : i32
    return %arg0, %c0_i32 : i32, i32
  }
}

</mosaic_0001>

<bundles_post_ra>
// kernel: tpu_custom_call.1
= control target key start
LH: loop header
LB: loop body
LE: loop exit
PB: predicated region body
PF: predicated region fallthrough
CT: control target
= control target key end

     0   :  { %vm30_vm0 = vcmask 64512   ;;  %s430_s1 = inlined_call_operand.vmem [shape: f32[8,128], index: 1, kind: input, shape index: {}]   ;;  %s431_s0 = inlined_call_operand.vmem [shape: f32[16,8], index: 0, kind: input, shape index: {}]   ;;  %s432_s3 = inlined_call_operand.vmem [shape: f32[128,8], index: 3, kind: input, shape index: {}]   ;;  %s433_s2 = inlined_call_operand.vmem [shape: f32[1,128], index: 2, kind: input, shape index: {}]   ;;  %s434_s4 = inlined_call_operand.vmem [shape: f32[1,8], index: 4, kind: input, shape index: {}]   ;;  %s435_s5 = inlined_call_operand.vmem [shape: f32[16,8], index: 5, kind: output, shape index: {}]  }
   0x1   :  { %v22_v0 = vld [vmem:[%s430_s1] sm:$0xff]  ;;  %v21_v2 = vld [vmem:[%s431_s0 + $0x8] sm:$0xff]  ;;  %v124_v5 = vld [vmem:[%s432_s3 + $0x10] sm:$0xff] }
   0x2   :  { %v20_v1 = vld [vmem:[%s431_s0] sm:$0xff]  ;;  %251 = vmatprep.subr.mxu0 %v22_v0  ;;  %v123_v4 = vld [vmem:[%s432_s3 + $0x8] sm:$0xff]  ;;  %v125_v7 = vld [vmem:[%s432_s3 + $0x18] sm:$0xff] }
   0x3   :  { %253 = vmatprep.mubr.msk.f32.mxu0 %vm30_vm0, %v20_v1  ;;  %v122_v3 = vld [vmem:[%s432_s3] sm:$0xff]  ;;  %252 = vmatpush3.msra.mxu0 %v22_v0  ;;  %v295_v8 = vpack.c.bf16 %v125_v7, %v124_v5  ;;  %v127_v10 = vld [vmem:[%s432_s3 + $0x28] sm:$0xff]  ;;  %v128_v12 = vld [vmem:[%s432_s3 + $0x30] sm:$0xff] }
   0x4   :  { %v291_v6 = vpack.c.bf16 %v123_v4, %v122_v3  ;;  %254 = vmatmul.mubr.msk.f32.vlgmr.msra.gmra.mrb[0].mxu0 %vm30_vm0, %v21_v2  ;;  %v126_v9 = vld [vmem:[%s432_s3 + $0x20] sm:$0xff]  ;;  %v129_v13 = vld [vmem:[%s432_s3 + $0x38] sm:$0xff]  ;;  %v131_v16 = vld [vmem:[%s432_s3 + $0x48] sm:$0xff] }
   0x5   :  { %v299_v11 = vpack.c.bf16 %v127_v10, %v126_v9  ;;  %v303_v14 = vpack.c.bf16 %v129_v13, %v128_v12  ;;  %v130_v15 = vld [vmem:[%s432_s3 + $0x40] sm:$0xff]  ;;  %v132_v18 = vld [vmem:[%s432_s3 + $0x50] sm:$0xff]  ;;  %v133_v19 = vld [vmem:[%s432_s3 + $0x58] sm:$0xff] }
   0x6   :  { %292 = vmatprep.subr.bf16.mxu1 %v291_v6  ;;  %v307_v17 = vpack.c.bf16 %v131_v16, %v130_v15  ;;  %v311_v20 = vpack.c.bf16 %v133_v19, %v132_v18  ;;  %v134_v21 = vld [vmem:[%s432_s3 + $0x60] sm:$0xff]  ;;  %v135_v22 = vld [vmem:[%s432_s3 + $0x68] sm:$0xff]  ;;  %v136_v24 = vld [vmem:[%s432_s3 + $0x70] sm:$0xff] }
   0x7   :  { %294 = vmatpush3.bf16.msra.mxu1 %v291_v6  ;;  %v315_v23 = vpack.c.bf16 %v135_v22, %v134_v21  ;;  %v137_v25 = vld [vmem:[%s432_s3 + $0x78] sm:$0xff]  ;;  %v226_v27 = vld [vmem:[%s433_s2] ss:$0 sm:$0xff] }
   0x8   :  { %296 = vmatprep.subr.bf16.mxu1 %v295_v8  ;;  %v319_v26 = vpack.c.bf16 %v137_v25, %v136_v24  ;;  %v229_v42 = vld [vmem:[%s434_s4] ss:$0 sm:$0xff] }
   0xb   :  { %298 = vmatpush3.bf16.msra.mxu1 %v295_v8 }
   0xc   :  { %300 = vmatprep.subr.bf16.mxu1 %v299_v11 }
   0xf   :  { %302 = vmatpush3.bf16.msra.mxu1 %v299_v11 }
  0x10   :  { %304 = vmatprep.subr.bf16.mxu1 %v303_v14 }
  0x13   :  { %306 = vmatpush3.bf16.msra.mxu1 %v303_v14 }
  0x14   :  { %308 = vmatprep.subr.bf16.mxu1 %v307_v17 }
  0x17   :  { %310 = vmatpush3.bf16.msra.mxu1 %v307_v17 }
  0x18   :  { %312 = vmatprep.subr.bf16.mxu1 %v311_v20 }
  0x1b   :  { %314 = vmatpush3.bf16.msra.mxu1 %v311_v20 }
  0x1c   :  { %316 = vmatprep.subr.bf16.mxu1 %v315_v23 }
  0x1f   :  { %318 = vmatpush3.bf16.msra.mxu1 %v315_v23 }
  0x20   :  { %320 = vmatprep.subr.bf16.mxu1 %v319_v26 }
  0x23   :  { %322 = vmatpush3.bf16.msra.mxu1 %v319_v26 }
  0xd7   :  { %v255_v28 = vpop.f32.mrb[0].mxu0 }
  0xd8   :  { %v109_v29 = vadd.f32 %v255_v28, %v226_v27  ;;  %v103_v30 = vpop.f32.mrb[1].mxu0 }
  0xd9   :  { %v104_v31 = vadd.f32 %v226_v27, %v103_v30 }
  0xda   :  { %v115_v32 = vmul.f32 0.70710677, %v109_v29  ;;  %v113_v39 = vmul.f32 0.5, %v109_v29 }
  0xdb   :  { %v114_v33 = vmul.f32 0.70710677, %v104_v31  ;;  %v112_v37 = vmul.f32 0.5, %v104_v31 }
  0xdc   :  { %323 = verf.f32 %v115_v32 }
  0xdd   :  { %325 = verf.f32 %v114_v33 }
  0xe6   :  { %v324_v34 = vpop.eup %323 }
  0xe7   :  { %v326_v35 = vpop.eup %325  ;;  %v119_v36 = vadd.f32 1.0, %v324_v34 }
  0xe8   :  { %v118_v38 = vadd.f32 1.0, %v326_v35 }
  0xe9   :  { %v121_v41 = vmul.f32 %v119_v36, %v113_v39 }
  0xea   :  { %v120_v40 = vmul.f32 %v118_v38, %v112_v37 }
  0xec   :  { %288 = vmatprep.mubr.f32.mxu1 %v120_v40 }
  0xed   :  { %289 = vmatmul.mubr.f32.vlgmr.msra.gmra.mrb[0].mxu1 %v121_v41 }
 0x1c0   :  { %v290_v43 = vpop.f32.mrb[0].mxu1 }
 0x1c1   :  { %v217_v44 = vadd.f32 %v290_v43, %v229_v42  ;;  %v211_v45 = vpop.f32.mrb[1].mxu1 }
 0x1c2   :  { %v212_v46 = vadd.f32 %v229_v42, %v211_v45 }
 0x1c3   :  { %221 = vst.msk [vmem:[%s435_s5 + $0x8] sm:$0xff] %vm30_vm0, %v217_v44 }
 0x1c4   :  { %220 = vst.msk [vmem:[%s435_s5] sm:$0xff] %vm30_vm0, %v212_v46 }

// kernel: tpu_custom_call.1
= control target key start
LH: loop header
LB: loop body
LE: loop exit
PB: predicated region body
PF: predicated region fallthrough
CT: control target
= control target key end

     0   :  { %vm30_vm0 = vcmask 64512   ;;  %s430_s1 = inlined_call_operand.vmem [shape: f32[8,128], index: 1, kind: input, shape index: {}]   ;;  %s431_s0 = inlined_call_operand.vmem [shape: f32[16,8], index: 0, kind: input, shape index: {}]   ;;  %s432_s3 = inlined_call_operand.vmem [shape: f32[128,8], index: 3, kind: input, shape index: {}]   ;;  %s433_s2 = inlined_call_operand.vmem [shape: f32[1,128], index: 2, kind: input, shape index: {}]   ;;  %s434_s4 = inlined_call_operand.vmem [shape: f32[1,8], index: 4, kind: input, shape index: {}]   ;;  %s435_s5 = inlined_call_operand.vmem [shape: f32[16,8], index: 5, kind: output, shape index: {}]  }
   0x1   :  { %v22_v0 = vld [vmem:[%s430_s1] sm:$0xff]  ;;  %v21_v2 = vld [vmem:[%s431_s0 + $0x8] sm:$0xff]  ;;  %v124_v5 = vld [vmem:[%s432_s3 + $0x10] sm:$0xff] }
   0x2   :  { %v20_v1 = vld [vmem:[%s431_s0] sm:$0xff]  ;;  %251 = vmatprep.subr.mxu0 %v22_v0  ;;  %v123_v4 = vld [vmem:[%s432_s3 + $0x8] sm:$0xff]  ;;  %v125_v7 = vld [vmem:[%s432_s3 + $0x18] sm:$0xff] }
   0x3   :  { %253 = vmatprep.mubr.msk.f32.mxu0 %vm30_vm0, %v20_v1  ;;  %v122_v3 = vld [vmem:[%s432_s3] sm:$0xff]  ;;  %252 = vmatpush3.msra.mxu0 %v22_v0  ;;  %v295_v8 = vpack.c.bf16 %v125_v7, %v124_v5  ;;  %v127_v10 = vld [vmem:[%s432_s3 + $0x28] sm:$0xff]  ;;  %v128_v12 = vld [vmem:[%s432_s3 + $0x30] sm:$0xff] }
   0x4   :  { %v291_v6 = vpack.c.bf16 %v123_v4, %v122_v3  ;;  %254 = vmatmul.mubr.msk.f32.vlgmr.msra.gmra.mrb[0].mxu0 %vm30_vm0, %v21_v2  ;;  %v126_v9 = vld [vmem:[%s432_s3 + $0x20] sm:$0xff]  ;;  %v129_v13 = vld [vmem:[%s432_s3 + $0x38] sm:$0xff]  ;;  %v131_v16 = vld [vmem:[%s432_s3 + $0x48] sm:$0xff] }
   0x5   :  { %v299_v11 = vpack.c.bf16 %v127_v10, %v126_v9  ;;  %v303_v14 = vpack.c.bf16 %v129_v13, %v128_v12  ;;  %v130_v15 = vld [vmem:[%s432_s3 + $0x40] sm:$0xff]  ;;  %v132_v18 = vld [vmem:[%s432_s3 + $0x50] sm:$0xff]  ;;  %v133_v19 = vld [vmem:[%s432_s3 + $0x58] sm:$0xff] }
   0x6   :  { %292 = vmatprep.subr.bf16.mxu1 %v291_v6  ;;  %v307_v17 = vpack.c.bf16 %v131_v16, %v130_v15  ;;  %v311_v20 = vpack.c.bf16 %v133_v19, %v132_v18  ;;  %v134_v21 = vld [vmem:[%s432_s3 + $0x60] sm:$0xff]  ;;  %v135_v22 = vld [vmem:[%s432_s3 + $0x68] sm:$0xff]  ;;  %v136_v24 = vld [vmem:[%s432_s3 + $0x70] sm:$0xff] }
   0x7   :  { %294 = vmatpush3.bf16.msra.mxu1 %v291_v6  ;;  %v315_v23 = vpack.c.bf16 %v135_v22, %v134_v21  ;;  %v137_v25 = vld [vmem:[%s432_s3 + $0x78] sm:$0xff]  ;;  %v226_v27 = vld [vmem:[%s433_s2] ss:$0 sm:$0xff] }
   0x8   :  { %296 = vmatprep.subr.bf16.mxu1 %v295_v8  ;;  %v319_v26 = vpack.c.bf16 %v137_v25, %v136_v24  ;;  %v229_v42 = vld [vmem:[%s434_s4] ss:$0 sm:$0xff] }
   0xb   :  { %298 = vmatpush3.bf16.msra.mxu1 %v295_v8 }
   0xc   :  { %300 = vmatprep.subr.bf16.mxu1 %v299_v11 }
   0xf   :  { %302 = vmatpush3.bf16.msra.mxu1 %v299_v11 }
  0x10   :  { %304 = vmatprep.subr.bf16.mxu1 %v303_v14 }
  0x13   :  { %306 = vmatpush3.bf16.msra.mxu1 %v303_v14 }
  0x14   :  { %308 = vmatprep.subr.bf16.mxu1 %v307_v17 }
  0x17   :  { %310 = vmatpush3.bf16.msra.mxu1 %v307_v17 }
  0x18   :  { %312 = vmatprep.subr.bf16.mxu1 %v311_v20 }
  0x1b   :  { %314 = vmatpush3.bf16.msra.mxu1 %v311_v20 }
  0x1c   :  { %316 = vmatprep.subr.bf16.mxu1 %v315_v23 }
  0x1f   :  { %318 = vmatpush3.bf16.msra.mxu1 %v315_v23 }
  0x20   :  { %320 = vmatprep.subr.bf16.mxu1 %v319_v26 }
  0x23   :  { %322 = vmatpush3.bf16.msra.mxu1 %v319_v26 }
  0xd7   :  { %v255_v28 = vpop.f32.mrb[0].mxu0 }
  0xd8   :  { %v109_v29 = vadd.f32 %v255_v28, %v226_v27  ;;  %v103_v30 = vpop.f32.mrb[1].mxu0 }
  0xd9   :  { %v104_v31 = vadd.f32 %v226_v27, %v103_v30 }
  0xda   :  { %v115_v32 = vmul.f32 0.70710677, %v109_v29  ;;  %v113_v39 = vmul.f32 0.5, %v109_v29 }
  0xdb   :  { %v114_v33 = vmul.f32 0.70710677, %v104_v31  ;;  %v112_v37 = vmul.f32 0.5, %v104_v31 }
  0xdc   :  { %323 = verf.f32 %v115_v32 }
  0xdd   :  { %325 = verf.f32 %v114_v33 }
  0xe6   :  { %v324_v34 = vpop.eup %323 }
  0xe7   :  { %v326_v35 = vpop.eup %325  ;;  %v119_v36 = vadd.f32 1.0, %v324_v34 }
  0xe8   :  { %v118_v38 = vadd.f32 1.0, %v326_v35 }
  0xe9   :  { %v121_v41 = vmul.f32 %v119_v36, %v113_v39 }
  0xea   :  { %v120_v40 = vmul.f32 %v118_v38, %v112_v37 }
  0xec   :  { %288 = vmatprep.mubr.f32.mxu1 %v120_v40 }
  0xed   :  { %289 = vmatmul.mubr.f32.vlgmr.msra.gmra.mrb[0].mxu1 %v121_v41 }
 0x1c0   :  { %v290_v43 = vpop.f32.mrb[0].mxu1 }
 0x1c1   :  { %v217_v44 = vadd.f32 %v290_v43, %v229_v42  ;;  %v211_v45 = vpop.f32.mrb[1].mxu1 }
 0x1c2   :  { %v212_v46 = vadd.f32 %v229_v42, %v211_v45 }
 0x1c3   :  { %221 = vst.msk [vmem:[%s435_s5 + $0x8] sm:$0xff] %vm30_vm0, %v217_v44 }
 0x1c4   :  { %220 = vst.msk [vmem:[%s435_s5] sm:$0xff] %vm30_vm0, %v212_v46 }

</bundles_post_ra>
